<compile_context>
chip_gen: v6e
topology: v6e:2x2x1
jax: 0.10.0
libtpu: 0.0.40
codegen_flags: <defaults>
</compile_context>

<pallas_src>
import functools

import jax
import jax.numpy as jnp
from jax.experimental import pallas as pl
from jax.experimental.pallas import tpu as pltpu


def _cdiv(a, b):
    return -(-a // b)


def _round_up(a, b):
    return _cdiv(a, b) * b


def _sublane_multiple(dtype):
    itemsize = jnp.dtype(dtype).itemsize
    return {4: 8, 2: 16, 1: 32}.get(itemsize, 8)


def _padded_tile_bytes(rows, cols, dtype):
    """Real VMEM footprint of a (rows, cols) tile after (sublane, lane) padding."""
    itemsize = jnp.dtype(dtype).itemsize
    sub = _sublane_multiple(dtype)
    return _round_up(rows, sub) * _round_up(cols, 128) * itemsize


def _vmem_limits():
    """(scoped vmem_limit_bytes, per-block in+out padded-byte budget)."""
    phys = None
    try:
        info = pltpu.get_tpu_info()
        phys = getattr(info, "vmem_capacity_bytes", None)
    except Exception:
        phys = None
    if phys is None:
        phys = 64 * 1024 * 1024          # conservative: assume v7x
    if phys >= 128 * 1024 * 1024:        # v5e / v6e
        limit = 64 * 1024 * 1024
    else:                                # v7x (64 MiB physical)
        limit = min(phys // 2, 32 * 1024 * 1024)
    # Double-buffered (2x in + 2x out) the chosen block stays well under limit.
    return limit, limit // 5


def _pick_nc_block(nc, per_plane_bytes, per_block_budget, min_steps=4):
    """Planes per grid step: fit padded-byte budget, keep >= min_steps steps,
    prefer an even step count (v7x: two TensorCores)."""
    max_blk = max(1, per_block_budget // max(per_plane_bytes, 1))
    target_steps = min(nc, min_steps)
    blk = max(1, min(max_blk, _cdiv(nc, target_steps), nc))
    steps = _cdiv(nc, blk)
    if steps > 1 and steps % 2 == 1:
        blk2 = max(1, _cdiv(nc, steps + 1))
        if _cdiv(nc, blk2) % 2 == 0:
            blk = blk2
    return blk


def _autopad_kernel_3d(x_ref, o_ref, *, pad_h, pad_w, h_in, w_in):
    """General path: one full-block zero store + one centered interior store.

    No narrow border-strip stores (they were 4/128-lane masked vst for zero
    HBM-traffic benefit); the output DMA writes the whole block regardless.
    """
    o_ref[...] = jnp.zeros(o_ref.shape, o_ref.dtype)
    o_ref[:, pad_h:pad_h + h_in, pad_w:pad_w + w_in] = x_ref[...]


def _autopad_kernel_flat(x_ref, o_ref, *, row_off, row_len):
    """Lane-dense path (pad_w == 0): spatial dims flattened onto the lane axis,
    so both stores are long contiguous lane runs."""
    o_ref[...] = jnp.zeros(o_ref.shape, o_ref.dtype)
    o_ref[:, row_off:row_off + row_len] = x_ref[...]


def auto_pad(to_be_padded: jax.Array, out_shape) -> jax.Array:
    """Zero-pads NCHW `to_be_padded` so spatial dims match out_shape[2:],
    centered — identical semantics to the PyTorch AutoPad."""
    n, c, h_in, w_in = to_be_padded.shape
    h_out, w_out = int(out_shape[2]), int(out_shape[3])

    if (h_in, w_in) == (h_out, w_out):
        return to_be_padded

    diff_h = h_out - h_in
    diff_w = w_out - w_in
    assert diff_h >= 0 and diff_w >= 0, "Output shape should be bigger"
    assert diff_h % 2 == 0 and diff_w % 2 == 0, "Odd difference in shape!"
    pad_h = diff_h // 2
    pad_w = diff_w // 2

    dtype = to_be_padded.dtype
    itemsize = jnp.dtype(dtype).itemsize
    nc = n * c
    vmem_limit, block_budget = _vmem_limits()
    bytes_accessed = nc * (h_in * w_in + h_out * w_out) * itemsize

    compiler_params = pltpu.CompilerParams(
        # Shards the fused NC axis across v7x's two TensorCores; harmless
        # no-op on single-TC v5e/v6e.
        dimension_semantics=("parallel",),
        vmem_limit_bytes=vmem_limit,
    )
    cost = pl.CostEstimate(flops=0, transcendentals=0,
                           bytes_accessed=bytes_accessed)

    if pad_w == 0:
        # Lane-dense layout: flatten (H, W) onto the lane axis; with pad_w == 0
        # the interior is a single contiguous flat slice.
        in_cols = h_in * w_in
        out_cols = h_out * w_out
        per_plane = (_round_up(in_cols, 128) + _round_up(out_cols, 128)) * itemsize
        nc_block = _pick_nc_block(nc, per_plane, block_budget)

        x_flat = to_be_padded.reshape(nc, in_cols)
        kernel = functools.partial(_autopad_kernel_flat,
                                   row_off=pad_h * w_in, row_len=in_cols)
        out_flat = pl.pallas_call(
            kernel,
            out_shape=jax.ShapeDtypeStruct((nc, out_cols), dtype),
            grid=(pl.cdiv(nc, nc_block),),
            in_specs=[pl.BlockSpec((nc_block, in_cols), lambda i: (i, 0))],
            out_specs=pl.BlockSpec((nc_block, out_cols), lambda i: (i, 0)),
            compiler_params=compiler_params,
            cost_estimate=cost,
        )(x_flat)
        return out_flat.reshape(n, c, h_out, w_out)

    # General path: (nc, H, W) blocks; per-plane VMEM cost uses padded tiles.
    per_plane = (_padded_tile_bytes(h_in, w_in, dtype) +
                 _padded_tile_bytes(h_out, w_out, dtype))
    nc_block = _pick_nc_block(nc, per_plane, block_budget)

    x3 = to_be_padded.reshape(nc, h_in, w_in)
    kernel = functools.partial(_autopad_kernel_3d,
                               pad_h=pad_h, pad_w=pad_w, h_in=h_in, w_in=w_in)
    out3 = pl.pallas_call(
        kernel,
        out_shape=jax.ShapeDtypeStruct((nc, h_out, w_out), dtype),
        grid=(pl.cdiv(nc, nc_block),),
        in_specs=[pl.BlockSpec((nc_block, h_in, w_in), lambda i: (i, 0, 0))],
        out_specs=pl.BlockSpec((nc_block, h_out, w_out), lambda i: (i, 0, 0)),
        compiler_params=compiler_params,
        cost_estimate=cost,
    )(x3)
    return out3.reshape(n, c, h_out, w_out)


if __name__ == "__main__":
    key = jax.random.PRNGKey(0)
    # Small NCHW input, padded up to a larger spatial resolution.
    x = jax.random.normal(key, (2, 4, 16, 16), dtype=jnp.float32)

    # Pad both spatial dims: (16, 16) -> (24, 24), 4 per side (general path).
    target_shape = (2, 4, 24, 24)
    out = jax.block_until_ready(auto_pad(x, target_shape))
    ref = jnp.pad(x, ((0, 0), (0, 0), (4, 4), (4, 4)), mode="constant")
    assert out.shape == target_shape, out.shape
    assert out.dtype == x.dtype
    assert jnp.array_equal(out, ref), "Mismatch vs reference zero-padding"

    # Pad only H (exercises the lane-dense flattened pad_w == 0 path).
    out_h = jax.block_until_ready(auto_pad(x, (2, 4, 24, 16)))
    ref_h = jnp.pad(x, ((0, 0), (0, 0), (4, 4), (0, 0)), mode="constant")
    assert jnp.array_equal(out_h, ref_h), "Mismatch in H-only padding"

    # No-op branch (shapes already equal).
    same = jax.block_until_ready(auto_pad(x, x.shape))
    assert jnp.array_equal(same, x)

    print("KERNEL_OK")
</pallas_src>

<mosaic_0001>
module attributes {stable_mosaic.version = 11 : i64} {
  func.func @_autopad_kernel_3d(%arg0: i32, %arg1: memref<2x16x16xf32, #tpu.memory_space<vmem>>, %arg2: memref<2x24x24xf32, #tpu.memory_space<vmem>>) attributes {dimension_semantics = [#tpu.dimension_semantics<parallel>], iteration_bounds = array<i64: 4>, scalar_prefetch = 0 : i64, scratch_operands = 0 : i64, tpu.core_type = #tpu.core_type<tc>, window_params = [{transform_indices = @transform_0, window_bounds = array<i64: 2, 16, 16>}, {transform_indices = @transform_1, window_bounds = array<i64: 2, 24, 24>}]} {
    %cst = arith.constant 0.000000e+00 : f32
    %0 = vector.broadcast %cst : f32 to vector<2x24x24xf32>
    %c0 = arith.constant 0 : index
    %c0_0 = arith.constant 0 : index
    %c0_1 = arith.constant 0 : index
    %1 = vector.load %arg2[%c0, %c0_0, %c0_1] : memref<2x24x24xf32, #tpu.memory_space<vmem>>, vector<2x24x24xf32>
    tpu.vector_store %arg2[%c0, %c0_0, %c0_1], %0 {strides = array<i32>} : memref<2x24x24xf32, #tpu.memory_space<vmem>>, vector<2x24x24xf32>,
    %c0_2 = arith.constant 0 : index
    %c0_3 = arith.constant 0 : index
    %c0_4 = arith.constant 0 : index
    %2 = vector.load %arg1[%c0_2, %c0_3, %c0_4] : memref<2x16x16xf32, #tpu.memory_space<vmem>>, vector<2x16x16xf32>
    %c0_5 = arith.constant 0 : index
    %c4 = arith.constant 4 : index
    %c4_6 = arith.constant 4 : index
    %3 = vector.load %arg2[%c0_5, %c4, %c4_6] : memref<2x24x24xf32, #tpu.memory_space<vmem>>, vector<2x16x16xf32>
    tpu.vector_store %arg2[%c0_5, %c4, %c4_6], %2 {strides = array<i32>} : memref<2x24x24xf32, #tpu.memory_space<vmem>>, vector<2x16x16xf32>,
    return
  }
  func.func @transform_0(%arg0: i32) -> (i32, i32, i32) {
    %c0_i32 = arith.constant 0 : i32
    %c0_i32_0 = arith.constant 0 : i32
    %c0_i32_1 = arith.constant 0 : i32
    return %arg0, %c0_i32, %c0_i32_0 : i32, i32, i32
  }
  func.func @transform_1(%arg0: i32) -> (i32, i32, i32) {
    %c0_i32 = arith.constant 0 : i32
    %c0_i32_0 = arith.constant 0 : i32
    %c0_i32_1 = arith.constant 0 : i32
    return %arg0, %c0_i32, %c0_i32_0 : i32, i32, i32
  }
}

</mosaic_0001>

<bundles_post_ra>
// kernel: tpu_custom_call.1
= control target key start
LH: loop header
LB: loop body
LE: loop exit
PB: predicated region body
PF: predicated region fallthrough
CT: control target
= control target key end

     0   :  { %6 = vsyncpa [#allocation3], 0  ;;  %s593_s0 = inlined_call_operand.hbm [shape: f32[8,16,16], index: 0, kind: input, shape index: {}]   ;;  %s594_s1 = inlined_call_operand.hbm [shape: f32[8,24,24], index: 1, kind: output, shape index: {}]  }
   0x1   :  { %8 = vsyncpa [#allocation3 + $0x1], 0 }
   0x2   :  { %9 = vsyncpa [#allocation4], 0 }
   0x3   :  { %11 = vsyncpa [#allocation4 + $0x1], 0  ;;  %s440_s6 = smov 0   ;;  %s442_s7 = smov 0  }
   0x4   :  { %s444_s8 = smov 0   ;;  %s446_s9 = smov 0  }
   0x5 LB: > { %s461_s10 = sadd.s32 4294967295, %s420_s9   ;;  %s258_s11 = sadd.s32 4294967294, %s420_s9   ;;  %s420_s9 = sphi %s446_s9, %s608_s9   ;;  %s416_s8 = sphi %s444_s8, %s607_s8   ;;  %s412_s7 = sphi %s442_s7, %s606_s7   ;;  %s408_s6 = sphi %s440_s6, %s605_s6  }
   0x6   : > { %s465_s12 = sadd.s32 1, %s420_s9   ;;  %s24_s13 = sadd.s32 1, %s416_s8 }
   0x7   : > { %s21_s14 = ssub.s32 %s420_s9, %s465_s12  ;;  %p31_p0 = scmp.ne.s32.totalorder %s416_s8, %s412_s7 }
   0x8   : > { %p22_p1 = scmp.eq.s32.totalorder %s21_s14, 0  ;;  %p32_p2 = scmp.eq.s32.totalorder %s420_s9, 0 }
   0x9   : > { %p37_p3 = scmp.ne.s32.totalorder %s412_s7, %s408_s6  ;;  %p38_p4 = scmp.eq.s32.totalorder %s461_s10, 0 }
   0xa   : > { %s477_s15 = scalar_select %p22_p1, %s416_s8, %s24_s13  }
   0xb   : > { %p479_p5 = por %p32_p2, %p31_p0  ;;  %p483_p6 = por %p38_p4, %p37_p3 }
   0xc   : > { %p61_p7 = scmp.eq.s32.totalorder %s461_s10, 3  ;;  %p67_p8 = scmp.eq.s32.totalorder %s258_s11, 3 }
   0xd   : > { %s598_s17 = scalar_select %p483_p6, 1, 0 }
   0xe   : > { %p288_p9 = scmp.lt.s32.totalorder %s420_s9, 4  ;;  %p489_p10 = por %p61_p7, %p31_p0 }
   0xf   : > { %p493_p11 = por %p67_p8, %p37_p3  ;;  %s87_s20 = sand.u32 1, %s416_s8  }
  0x10   : > { %s599_s18 = scalar_select %p489_p10, 1, 0 }
  0x11   : > { %s600_s19 = scalar_select %p493_p11, 1, 0 }
  0x12   : > { %s273_s21 = sshll.u32 %s420_s9, 9  ;;  %s261_s22 = sshll.u32 %s87_s20, 5 }
  0x13   : > { %s502_s25 = scalar_lea.hbm %s593_s0, %s273_s21  ;;  %s91_s26 = scalar_lea.vmem [#allocation2], %s261_s22 }
  0x14   : > { %s99_s27 = sshll.u32 %s91_s26, 4  ;;  %p506_p12 = pnand %p288_p9, %p479_p5  ;;  %s510_s27 = int_to_ptr.vmem [resolvable:$true] %s99_s27 }
  0x15   : > { %s512_s29 = scalar_lea.sflag [#allocation3], %s87_s20  ;;  %s328_s30 = scalar_lea.hbm %s502_s25, 512 }
  0x16   : > { %p329_p13 = scmp.ne.s32.totalorder %s502_s25, %s328_s30  ;;  %p330_p0 = pneg %p506_p12 }
  0x17   : > { %s333_s4 = scalar_lea.hbm %s593_s0, 2048  ;;  %p334_p3 = scmp.lt.s32.totalorder %s502_s25, %s593_s0 }
  0x18   : > { %p331_p1 = pnand %p330_p0, %p329_p13  ;;  %p335_p4 = scmp.lt.s32.totalorder %s333_s4, %s328_s30 }
  0x1a   : > { %p332_p2 = pneg %p331_p1  ;;  %p336_p5 = por %p335_p4, %p334_p3 }
  0x1c   : > { %p337_p7 = pnand %p336_p5, %p332_p2 }
  0x1e   : > { %340 = shalt.err (!%p337_p7)
}
  0x1f   : > { %s341_s13 = scalar_lea.vmem %s510_s27, 512  ;;  %s422_s14 = smov [#allocation2]  }
  0x20   : > { %p342_p8 = scmp.ne.s32.totalorder %s510_s27, %s341_s13  ;;  %s346_s16 = sshll.u32 %s422_s14, 4  ;;  %s347_s16 = int_to_ptr.vmem [resolvable:$false] %s346_s16 }
  0x21   : > { %s348_s20 = scalar_lea.vmem %s347_s16, 1024  ;;  %p349_p1 = scmp.lt.s32.totalorder %s510_s27, %s347_s16 }
  0x22   : > { %p344_p9 = pnand %p342_p8, %p330_p0  ;;  %p350_p11 = scmp.lt.s32.totalorder %s348_s20, %s341_s13 }
  0x24   : > { %p345_p13 = pneg %p344_p9  ;;  %p351_p10 = por %p350_p11, %p349_p1 }
  0x26   : > { %p352_p6 = pnand %p351_p10, %p345_p13 }
  0x28   : > { %355 = shalt.err (!%p352_p6)
}
  0x29   : > { %s423_s21 = smov 128   ;;  %s424_s22 = smov 8  }
  0x2a   : > { %283 = dma.hbm_to_vmem [thread:$0]  (!%p506_p12), %s502_s25, 512, %s510_s27, %s512_s29, %s423_s21, %s423_s21, %s424_s22  }
  0x2b   : > { %p265_p0 = scmp.ge.s32.totalorder %s420_s9, 1  ;;  %p107_p2 = scmp.lt.s32.totalorder %s420_s9, 5 }
  0x2d   : > { %p108_p3 = pnand %p265_p0, %p107_p2 }
  0x2e   : > { %s536_s23 = sand.u32 (!%p108_p3), 1, %s412_s7   ;;  %p602_p6 = scmp.ne.s32.totalorder (!%p108_p3), %s598_s17, 0 }
  0x2f   : > { %111 = sbr.rel (%p108_p3) target bundleno = 188 (0xbc), region = 24  ;;  %s266_s24 = sshll.u32 (!%p108_p3), %s536_s23, 5 }
  0x30   : > { %s114_s26 = scalar_lea.sflag (!%p108_p3), [#allocation3], %s536_s23  ;;  %s117_s30 = scalar_lea.vmem (!%p108_p3), [#allocation2], %s266_s24 }
  0x34   : > { %399 = dma.done.wait (%p602_p6), %s114_s26, 512  }
  0x35   : > { %401 = vsyncadd (%p602_p6), %s114_s26, 4294966784  ;;  %s274_s25 = smul.u32 48, %s536_s23  ;;  %vm138_vm0 = vcmask 195584   ;;  %v425_v0 = vmov 0.0   ;;  %v147_v1 = vld [vmem:[%s117_s30 + $0x10] sm:$0xff]  ;;  %v145_v2 = vld [vmem:[%s117_s30] sm:$0xff] }
  0x36   : > { %s426_s28 = smov 4   ;;  %v148_v3 = vld [vmem:[%s117_s30 + $0x18] sm:$0xff]  ;;  %v146_v4 = vld [vmem:[%s117_s30 + $0x8] sm:$0xff]  ;;  %vm165_vm1 = vcmask 162848   ;;  %s275_s17 = smul.u32 768, %s461_s10 }
  0x37   : > { %s135_s27 = scalar_lea.vmem [#allocation5], %s274_s25  ;;  %157 = vrot.lane.b32.xlu1 %v147_v1, %s426_s28  ;;  %153 = vrot.lane.b32.xlu0 %v145_v2, %s426_s28  ;;  %s171_s10 = scalar_lea.sflag [#allocation4], %s536_s23 }
  0x38   : > { %142 = vst.msk [vmem:[%s135_s27 + $0x18] sm:$0xff] %vm138_vm0, %v425_v0  ;;  %143 = vst.msk [vmem:[%s135_s27 + $0x20] sm:$0xff] %vm138_vm0, %v425_v0  ;;  %s185_s29 = sshll.u32 %s135_s27, 4  ;;  %s549_s4 = scalar_lea.hbm %s594_s1, %s275_s17  ;;  %s551_s29 = int_to_ptr.vmem [resolvable:$true] %s185_s29 }
  0x39   : > { %139 = vst.msk [vmem:[%s135_s27] sm:$0xff] %vm138_vm0, %v425_v0  ;;  %140 = vst.msk [vmem:[%s135_s27 + $0x8] sm:$0xff] %vm138_vm0, %v425_v0  ;;  %s356_s5 = scalar_lea.vmem %s551_s29, 768  ;;  %p603_p11 = scmp.ne.s32.totalorder %s599_s18, 0 }
  0x3a   : > { %141 = vst.msk [vmem:[%s135_s27 + $0x10] sm:$0xff] %vm138_vm0, %v425_v0  ;;  %144 = vst.msk [vmem:[%s135_s27 + $0x28] sm:$0xff] %vm138_vm0, %v425_v0  ;;  %p357_p10 = scmp.ne.s32.totalorder %s551_s29, %s356_s5  ;;  %s427_s11 = smov [#allocation5]  }
  0x3b   : > { %159 = vrot.lane.b32.xlu1 %v148_v3, %s426_s28  ;;  %155 = vrot.lane.b32.xlu0 %v146_v4, %s426_s28  ;;  %s360_s13 = sshll.u32 %s427_s11, 4  ;;  %s361_s13 = int_to_ptr.vmem [resolvable:$false] %s360_s13 }
  0x3c   : > { %p358_p12 = pnand %p357_p10, %p603_p11  ;;  %s362_s14 = scalar_lea.vmem %s361_s13, 1536 }
  0x3d   : > { %p363_p5 = scmp.lt.s32.totalorder %s551_s29, %s361_s13  ;;  %p364_p7 = scmp.lt.s32.totalorder %s362_s14, %s356_s5 }
  0x3e   : > { %p359_p4 = pneg %p358_p12 }
  0x3f   : > { %p365_p8 = por %p364_p7, %p363_p5 }
  0x41   : > { %p366_p9 = pnand %p365_p8, %p359_p4 }
  0xa9   : > { %v158_v5 = vpop.permute.xlu1 %157  ;;  %v154_v6 = vpop.permute.xlu0 %153 }
  0xaa   : > { %168 = vst.msk [vmem:[%s135_s27 + $0x1c] sm:$0xff] %vm165_vm1, %v158_v5  ;;  %166 = vst.msk [vmem:[%s135_s27 + $0x4] sm:$0xff] %vm165_vm1, %v154_v6 }
  0xad   : > { %v160_v7 = vpop.permute.xlu1 %159  ;;  %v156_v8 = vpop.permute.xlu0 %155 }
  0xae   : > { %169 = vst.msk [vmem:[%s135_s27 + $0x24] sm:$0xff] %vm165_vm1, %v160_v7  ;;  %167 = vst.msk [vmem:[%s135_s27 + $0xc] sm:$0xff] %vm165_vm1, %v156_v8 }
  0xaf   : > { %369 = shalt.err (!%p366_p9)
}
  0xb0   : > { %s370_s16 = scalar_lea.hbm %s549_s4, 768  ;;  %s374_s22 = scalar_lea.hbm %s594_s1, 3072 }
  0xb1   : > { %p371_p13 = scmp.ne.s32.totalorder %s549_s4, %s370_s16  ;;  %p375_p2 = scmp.lt.s32.totalorder %s549_s4, %s594_s1 }
  0xb2   : > { %p376_p3 = scmp.lt.s32.totalorder %s374_s22, %s370_s16 }
  0xb3   : > { %p372_p1 = pnand %p371_p13, %p603_p11 }
  0xb4   : > { %p377_p6 = por %p376_p3, %p375_p2 }
  0xb5   : > { %p373_p0 = pneg %p372_p1 }
  0xb7   : > { %p378_p10 = pnand %p377_p6, %p373_p0 }
  0xb9   : > { %381 = shalt.err (!%p378_p10)
}
  0xba   : > { %s428_s30 = smov 128   ;;  %s429_s25 = smov 8  }
  0xbb   : > { %278 = dma.vmem_to_hbm [thread:$0]  (%p603_p11), %s551_s29, 768, %s549_s4, %s171_s10, %s428_s30, %s428_s30, %s429_s25  }
  0xbc PF: > { %p289_p12 = scmp.ge.s32.totalorder %s420_s9, 2  ;;  %s200_s27 = sand.u32 1, %s408_s6  }
  0xbd   : > { %p604_p4 = scmp.ne.s32.totalorder %s600_s19, 0  ;;  %s201_s28 = scalar_lea.sflag [#allocation4], %s200_s27 }
  0xbf   : > { %p285_p5 = pnand %p289_p12, %p604_p4 }
  0xc1   : > { %p286_p7 = pneg %p285_p5 }
  0xc3   : > { %403 = dma.done.wait (%p286_p7), %s201_s28, 768  }
  0xc4   : > { %405 = vsyncadd (%p286_p7), %s201_s28, 4294966528  ;;  %p14_p8 = scmp.ge.s32.totalorder %s465_s12, 6   ;;  %s605_s6 = smov %s412_s7 }
  0xc5   : > { %s606_s7 = smov %s416_s8  ;;  %s607_s8 = smov %s477_s15 }
  0xc6   : > { %s608_s9 = smov %s465_s12  ;;  %16 = sbr.rel (!%p14_p8) target bundleno = 5 (0x5), region = 69 }
  0xcb   :  { %206 = vsyncpa [#allocation3], 1 }
  0xcc   :  { %208 = vsyncpa [#allocation3 + $0x1], 1 }
  0xcd   :  { %209 = vsyncpa [#allocation4], 1 }
  0xce   :  { %211 = vsyncpa [#allocation4 + $0x1], 1 }

</bundles_post_ra>
